<compile_context>
chip_gen: v5e
topology: v5e:2x2
jax: 0.10.0
libtpu: 0.0.40
codegen_flags: <defaults>
</compile_context>

<pallas_src>
import functools

import jax
import jax.numpy as jnp
from jax.experimental import pallas as pl
from jax.experimental.pallas import tpu as pltpu


def _style_bn_kernel(p_ref, tmean_ref, tstd_ref, out_ref,
                     sum_d_ref, sum_d2_ref,
                     *, hw_total, tile_hw, needs_mask):
    """p_ref: (TR, THW); tmean/tstd: (TR, 1); out_ref: (TR, 1) per-row sq-err."""
    k = pl.program_id(1)

    @pl.when(k == 0)
    def _():
        sum_d_ref[...] = jnp.zeros_like(sum_d_ref)
        sum_d2_ref[...] = jnp.zeros_like(sum_d2_ref)

    x = p_ref[...].astype(jnp.float32)                     # cast per-tile (VPU)
    tm = tmean_ref[...].astype(jnp.float32)                # (TR, 1)
    d = x - tm                                             # shifted by target mean
    if needs_mask:
        col = jax.lax.broadcasted_iota(jnp.int32, x.shape, dimension=1)
        valid = (k * tile_hw + col) < hw_total
        d = jnp.where(valid, d, jnp.float32(0.0))
    sum_d_ref[...] += jnp.sum(d, axis=-1, keepdims=True)
    sum_d2_ref[...] += jnp.sum(d * d, axis=-1, keepdims=True)

    @pl.when(k == pl.num_programs(1) - 1)
    def _():
        inv_hw = jnp.float32(1.0 / hw_total)
        sd = sum_d_ref[...]
        sd2 = sum_d2_ref[...]
        dm = sd * inv_hw                                   # p_mean - t_mean
        # unbiased variance; clamp tiny negative rounding before sqrt
        var = (sd2 - sd * sd * inv_hw) * jnp.float32(1.0 / (hw_total - 1))
        var = jnp.maximum(var, jnp.float32(0.0))
        ds = jnp.sqrt(var) - tstd_ref[...].astype(jnp.float32)
        out_ref[...] = dm * dm + ds * ds


def _choose_tiles(R, HW):
    # HW tile: full extent when small (single block, no alignment constraint);
    # otherwise a 1024-lane multiple-of-128 tile to hit ~85%+ of HBM roofline.
    tile_hw = HW if HW <= 1024 else 1024
    # R tile: full extent when small; otherwise 256 rows (multiple of 8),
    # keeping the double-buffered p tile around 2 MiB — safe for v7x VMEM.
    tile_r = R if R <= 256 else 256
    return tile_r, tile_hw


def _style_bn_layer_rowloss(p2d, t_mean, t_std):
    """p2d: (R, HW) native dtype, t_mean/t_std: (R, 1) f32 -> (R, 1) sq errors."""
    R, HW = p2d.shape
    tile_r, tile_hw = _choose_tiles(R, HW)
    grid = (pl.cdiv(R, tile_r), pl.cdiv(HW, tile_hw))
    needs_mask = (HW % tile_hw) != 0
    kernel = functools.partial(
        _style_bn_kernel, hw_total=HW, tile_hw=tile_hw, needs_mask=needs_mask)
    return pl.pallas_call(
        kernel,
        out_shape=jax.ShapeDtypeStruct((R, 1), jnp.float32),
        grid_spec=pltpu.PrefetchScalarGridSpec(
            num_scalar_prefetch=0,
            grid=grid,
            in_specs=[
                pl.BlockSpec((tile_r, tile_hw), lambda r, k: (r, k)),
                pl.BlockSpec((tile_r, 1), lambda r, k: (r, 0)),  # resident over k
                pl.BlockSpec((tile_r, 1), lambda r, k: (r, 0)),  # resident over k
            ],
            out_specs=pl.BlockSpec((tile_r, 1), lambda r, k: (r, 0)),
            scratch_shapes=[
                pltpu.VMEM((tile_r, 1), jnp.float32),   # sum(d)
                pltpu.VMEM((tile_r, 1), jnp.float32),   # sum(d^2)
            ],
        ),
        compiler_params=pltpu.CompilerParams(
            dimension_semantics=("parallel", "arbitrary")),
    )(p2d, t_mean, t_std)


class StyleLossBN:
    """JAX/Pallas equivalent of StyleLoss_BN."""

    def __init__(self, targets, weights=None):
        # Target statistics at init time: plain-JAX glue (matches
        # t.mean(dim=(-2,-1)), t.std(dim=(-2,-1)) with unbiased std).
        self.targets_mean = [jnp.mean(t, axis=(-2, -1)) for t in targets]
        self.targets_std = [jnp.std(t, axis=(-2, -1), ddof=1) for t in targets]
        self.weights = [1.0] * len(targets) if weights is None else weights

    def __call__(self, preds):
        # TODO(synk): HW == 1 gives inf/NaN (ddof=1), same as torch.std.
        loss = jnp.float32(0.0)
        for p, t_mean, t_std, w in zip(
            preds, self.targets_mean, self.targets_std, self.weights
        ):
            C = p.shape[-3]                      # channels
            HW = p.shape[-2] * p.shape[-1]
            R = int(p.size // HW)                # N*C (or C for 3-D input)
            p2d = p.reshape(R, HW)               # native dtype, no upcast copy
            tm = t_mean.reshape(R, 1).astype(jnp.float32)
            ts = t_std.reshape(R, 1).astype(jnp.float32)
            row_err = _style_bn_layer_rowloss(p2d, tm, ts)   # (R, 1)
            loss = loss + jnp.sum(row_err) * (float(w) / C)
        return loss


def _reference_loss(preds, targets, weights):
    loss = jnp.float32(0.0)
    for p, t, w in zip(preds, targets, weights):
        t_mean = jnp.mean(t, axis=(-2, -1))
        t_std = jnp.std(t, axis=(-2, -1), ddof=1)
        p_mean = jnp.mean(p.astype(jnp.float32), axis=(-2, -1))
        p_std = jnp.std(p.astype(jnp.float32), axis=(-2, -1), ddof=1)
        loss = loss + jnp.sum(
            (p_mean - t_mean) ** 2 + (p_std - t_std) ** 2
        ) * w / p_mean.shape[-1]
    return loss


if __name__ == "__main__":
    key = jax.random.PRNGKey(0)
    k1, k2, k3, k4, k5, k6 = jax.random.split(key, 6)

    # Three "style feature" layers, NCHW.  The third (HW = 40*40 = 1600 > 1024)
    # exercises the tiled + masked HW reduction path; the first two use the
    # single-block small-layer path.
    t1 = jax.random.normal(k1, (2, 4, 16, 16), dtype=jnp.float32)
    t2 = jax.random.normal(k2, (2, 8, 8, 8), dtype=jnp.float32)
    t3 = jax.random.normal(k3, (1, 8, 40, 40), dtype=jnp.float32)
    p1 = jax.random.normal(k4, (2, 4, 16, 16), dtype=jnp.float32)
    p2 = jax.random.normal(k5, (2, 8, 8, 8), dtype=jnp.float32)
    p3 = jax.random.normal(k6, (1, 8, 40, 40), dtype=jnp.float32)

    targets = [t1, t2, t3]
    preds = [p1, p2, p3]
    weights = [1.0, 0.5, 2.0]

    loss_mod = StyleLossBN(targets, weights)
    loss = jax.block_until_ready(loss_mod(preds))

    ref = jax.block_until_ready(_reference_loss(preds, targets, weights))
    assert jnp.allclose(loss, ref, rtol=1e-4, atol=1e-5), (loss, ref)

    print("KERNEL_OK")
</pallas_src>

<mosaic_0001>
module attributes {stable_mosaic.version = 11 : i64} {
  func.func @_style_bn_kernel(%arg0: i32, %arg1: i32, %arg2: memref<8x256xf32, #tpu.memory_space<vmem>>, %arg3: memref<8x1xf32, #tpu.memory_space<vmem>>, %arg4: memref<8x1xf32, #tpu.memory_space<vmem>>, %arg5: memref<8x1xf32, #tpu.memory_space<vmem>>, %arg6: memref<8x1xf32, #tpu.memory_space<vmem>>, %arg7: memref<8x1xf32, #tpu.memory_space<vmem>>) attributes {dimension_semantics = [#tpu.dimension_semantics<parallel>, #tpu.dimension_semantics<arbitrary>], iteration_bounds = array<i64: 1, 1>, scalar_prefetch = 0 : i64, scratch_operands = 2 : i64, tpu.core_type = #tpu.core_type<tc>, window_params = [{transform_indices = @transform_0, window_bounds = array<i64: 8, 256>}, {transform_indices = @transform_1, window_bounds = array<i64: 8, 1>}, {transform_indices = @transform_2, window_bounds = array<i64: 8, 1>}, {transform_indices = @transform_3, window_bounds = array<i64: 8, 1>}]} {
    %c0_i32 = arith.constant 0 : i32
    %0 = arith.cmpi eq, %arg1, %c0_i32 : i32
    %1 = arith.extui %0 : i1 to i32
    %c0_i32_0 = arith.constant 0 : i32
    %2 = arith.cmpi ne, %1, %c0_i32_0 : i32
    scf.if %2 {
      %cst_15 = arith.constant 0.000000e+00 : f32
      %21 = vector.broadcast %cst_15 : f32 to vector<8x1xf32>
      %c0_16 = arith.constant 0 : index
      %c0_17 = arith.constant 0 : index
      %22 = vector.load %arg6[%c0_16, %c0_17] : memref<8x1xf32, #tpu.memory_space<vmem>>, vector<8x1xf32>
      tpu.vector_store %arg6[%c0_16, %c0_17], %21 {strides = array<i32>} : memref<8x1xf32, #tpu.memory_space<vmem>>, vector<8x1xf32>,
      %cst_18 = arith.constant 0.000000e+00 : f32
      %23 = vector.broadcast %cst_18 : f32 to vector<8x1xf32>
      %c0_19 = arith.constant 0 : index
      %c0_20 = arith.constant 0 : index
      %24 = vector.load %arg7[%c0_19, %c0_20] : memref<8x1xf32, #tpu.memory_space<vmem>>, vector<8x1xf32>
      tpu.vector_store %arg7[%c0_19, %c0_20], %23 {strides = array<i32>} : memref<8x1xf32, #tpu.memory_space<vmem>>, vector<8x1xf32>,
    } else {
    }
    %c0 = arith.constant 0 : index
    %c0_1 = arith.constant 0 : index
    %3 = vector.load %arg2[%c0, %c0_1] : memref<8x256xf32, #tpu.memory_space<vmem>>, vector<8x256xf32>
    %c0_2 = arith.constant 0 : index
    %c0_3 = arith.constant 0 : index
    %4 = vector.load %arg3[%c0_2, %c0_3] : memref<8x1xf32, #tpu.memory_space<vmem>>, vector<8x1xf32>
    %5 = vector.broadcast %4 : vector<8x1xf32> to vector<8x256xf32>
    %6 = arith.subf %3, %5 : vector<8x256xf32>
    %c0_4 = arith.constant 0 : index
    %c0_5 = arith.constant 0 : index
    %7 = vector.load %arg6[%c0_4, %c0_5] : memref<8x1xf32, #tpu.memory_space<vmem>>, vector<8x1xf32>
    %cst = arith.constant dense<0.000000e+00> : vector<8xf32>
    %8 = vector.multi_reduction <add>, %6, %cst [1] : vector<8x256xf32> to vector<8xf32>
    %9 = vector.shape_cast %8 : vector<8xf32> to vector<8x1xf32>
    %10 = arith.addf %7, %9 : vector<8x1xf32>
    %c0_6 = arith.constant 0 : index
    %c0_7 = arith.constant 0 : index
    %11 = vector.load %arg6[%c0_6, %c0_7] : memref<8x1xf32, #tpu.memory_space<vmem>>, vector<8x1xf32>
    tpu.vector_store %arg6[%c0_6, %c0_7], %10 {strides = array<i32>} : memref<8x1xf32, #tpu.memory_space<vmem>>, vector<8x1xf32>,
    %c0_8 = arith.constant 0 : index
    %c0_9 = arith.constant 0 : index
    %12 = vector.load %arg7[%c0_8, %c0_9] : memref<8x1xf32, #tpu.memory_space<vmem>>, vector<8x1xf32>
    %13 = arith.mulf %6, %6 : vector<8x256xf32>
    %cst_10 = arith.constant dense<0.000000e+00> : vector<8xf32>
    %14 = vector.multi_reduction <add>, %13, %cst_10 [1] : vector<8x256xf32> to vector<8xf32>
    %15 = vector.shape_cast %14 : vector<8xf32> to vector<8x1xf32>
    %16 = arith.addf %12, %15 : vector<8x1xf32>
    %c0_11 = arith.constant 0 : index
    %c0_12 = arith.constant 0 : index
    %17 = vector.load %arg7[%c0_11, %c0_12] : memref<8x1xf32, #tpu.memory_space<vmem>>, vector<8x1xf32>
    tpu.vector_store %arg7[%c0_11, %c0_12], %16 {strides = array<i32>} : memref<8x1xf32, #tpu.memory_space<vmem>>, vector<8x1xf32>,
    %c0_i32_13 = arith.constant 0 : i32
    %18 = arith.cmpi eq, %arg1, %c0_i32_13 : i32
    %19 = arith.extui %18 : i1 to i32
    %c0_i32_14 = arith.constant 0 : i32
    %20 = arith.cmpi ne, %19, %c0_i32_14 : i32
    scf.if %20 {
      %c0_15 = arith.constant 0 : index
      %c0_16 = arith.constant 0 : index
      %21 = vector.load %arg6[%c0_15, %c0_16] : memref<8x1xf32, #tpu.memory_space<vmem>>, vector<8x1xf32>
      %c0_17 = arith.constant 0 : index
      %c0_18 = arith.constant 0 : index
      %22 = vector.load %arg7[%c0_17, %c0_18] : memref<8x1xf32, #tpu.memory_space<vmem>>, vector<8x1xf32>
      %cst_19 = arith.constant 3.906250e-03 : f32
      %23 = vector.broadcast %cst_19 : f32 to vector<8x1xf32>
      %24 = arith.mulf %21, %23 : vector<8x1xf32>
      %25 = arith.mulf %21, %21 : vector<8x1xf32>
      %cst_20 = arith.constant 3.906250e-03 : f32
      %26 = vector.broadcast %cst_20 : f32 to vector<8x1xf32>
      %27 = arith.mulf %25, %26 : vector<8x1xf32>
      %28 = arith.subf %22, %27 : vector<8x1xf32>
      %cst_21 = arith.constant 0.00392156886 : f32
      %29 = vector.broadcast %cst_21 : f32 to vector<8x1xf32>
      %30 = arith.mulf %28, %29 : vector<8x1xf32>
      %cst_22 = arith.constant 0.000000e+00 : f32
      %31 = vector.broadcast %cst_22 : f32 to vector<8x1xf32>
      %32 = arith.maximumf %30, %31 : vector<8x1xf32>
      %33 = math.sqrt %32 : vector<8x1xf32>
      %c0_23 = arith.constant 0 : index
      %c0_24 = arith.constant 0 : index
      %34 = vector.load %arg4[%c0_23, %c0_24] : memref<8x1xf32, #tpu.memory_space<vmem>>, vector<8x1xf32>
      %35 = arith.subf %33, %34 : vector<8x1xf32>
      %36 = arith.mulf %24, %24 : vector<8x1xf32>
      %37 = arith.mulf %35, %35 : vector<8x1xf32>
      %38 = arith.addf %36, %37 : vector<8x1xf32>
      %c0_25 = arith.constant 0 : index
      %c0_26 = arith.constant 0 : index
      %39 = vector.load %arg5[%c0_25, %c0_26] : memref<8x1xf32, #tpu.memory_space<vmem>>, vector<8x1xf32>
      tpu.vector_store %arg5[%c0_25, %c0_26], %38 {strides = array<i32>} : memref<8x1xf32, #tpu.memory_space<vmem>>, vector<8x1xf32>,
    } else {
    }
    return
  }
  func.func @transform_0(%arg0: i32, %arg1: i32) -> (i32, i32) {
    %c0_i32 = arith.constant 0 : i32
    return %arg0, %arg1 : i32, i32
  }
  func.func @transform_1(%arg0: i32, %arg1: i32) -> (i32, i32) {
    %c0_i32 = arith.constant 0 : i32
    %c0_i32_0 = arith.constant 0 : i32
    return %arg0, %c0_i32 : i32, i32
  }
  func.func @transform_2(%arg0: i32, %arg1: i32) -> (i32, i32) {
    %c0_i32 = arith.constant 0 : i32
    %c0_i32_0 = arith.constant 0 : i32
    return %arg0, %c0_i32 : i32, i32
  }
  func.func @transform_3(%arg0: i32, %arg1: i32) -> (i32, i32) {
    %c0_i32 = arith.constant 0 : i32
    %c0_i32_0 = arith.constant 0 : i32
    return %arg0, %c0_i32 : i32, i32
  }
}

</mosaic_0001>

<bundles_post_ra>
// kernel: tpu_custom_call.1
= control target key start
LH: loop header
LB: loop body
LE: loop exit
PB: predicated region body
PF: predicated region fallthrough
CT: control target
= control target key end

     0   :  { %v84_v0 = vmov 0   ;;  %vm18_vm0 = vcmask 7168   ;;  %v85_v2 = vmov 0.0   ;;  %s126_s1 = inlined_call_operand.vmem [shape: f32[8,1], index: 1, kind: input, shape index: {}]   ;;  %s127_s0 = inlined_call_operand.vmem [shape: f32[8,256], index: 0, kind: input, shape index: {}]   ;;  %s128_s2 = inlined_call_operand.vmem [shape: f32[8,1], index: 2, kind: input, shape index: {}]   ;;  %s129_s3 = inlined_call_operand.vmem [shape: f32[8,1], index: 3, kind: output, shape index: {}]  }
   0x1   :  { %81 = vset.pattern.permute.xlu0 %v84_v0  ;;  %v23_v1 = vld [vmem:[%s126_s1] sm:$0xff]  ;;  %19 = vst.msk [vmem:[#allocation2] sm:$0xff] %vm18_vm0, %v85_v2  ;;  %v22_v4 = vld [vmem:[%s127_s0 + $0x8] sm:$0xff] }
   0x2   :  { %26 = vperm.xlu0 %81, %v23_v1   ;;  %20 = vst.msk [vmem:[#allocation3] sm:$0xff] %vm18_vm0, %v85_v2  ;;  %v21_v3 = vld [vmem:[%s127_s0] sm:$0xff] }
   0x3   :  { %v69_v32 = vld [vmem:[%s128_s2] sm:$0xff] }
   0x8   :  { %v31_v12 = vld [vmem:[#allocation2] sm:$0xff] }
   0x9   :  { %v38_v14 = vld [vmem:[#allocation3] sm:$0xff] }
  0x74   :  { %v27_v5 = vpop.permute.xlu0 %26 }
  0x75   :  { %v29_v6 = vsub.f32 %v21_v3, %v27_v5  ;;  %v30_v7 = vsub.f32 %v22_v4, %v27_v5 }
  0x77   :  { %v32_v8 = vadd.f32 %v30_v7, %v29_v6  ;;  %v39_v9 = vmul.f32 %v29_v6, %v29_v6  ;;  %v40_v10 = vmul.f32 %v30_v7, %v30_v7 }
  0x79   :  { %33 = vadd.xlane.f32.xlu0 %v32_v8  ;;  %v41_v11 = vadd.f32 %v40_v10, %v39_v9 }
  0x7b   :  { %42 = vadd.xlane.f32.xlu1 %v41_v11 }
  0xec   :  { %v34_v13 = vpop.xlane.xlu0 %33 }
  0xed   :  { %v35_v15 = vadd.f32 %v34_v13, %v31_v12 }
  0xee   :  { %v43_v16 = vpop.xlane.xlu1 %42 }
  0xef   :  { %37 = vst.msk [vmem:[#allocation2] sm:$0xff] %vm18_vm0, %v35_v15  ;;  %v44_v17 = vadd.f32 %v43_v16, %v38_v14 }
  0xf1   :  { %45 = vst.msk [vmem:[#allocation3] sm:$0xff] %vm18_vm0, %v44_v17 }
  0xf6   :  { %v49_v18 = vld [vmem:[#allocation2] sm:$0xff] }
  0xf7   :  { %v52_v19 = vmul.f32 %v49_v18, %v49_v18  ;;  %v51_v34 = vmul.f32 0.00390625, %v49_v18 }
  0xf8   :  { %v50_v21 = vld [vmem:[#allocation3] sm:$0xff] }
  0xf9   :  { %v53_v20 = vmul.f32 0.00390625, %v52_v19  ;;  %v71_v38 = vmul.f32 %v51_v34, %v51_v34 }
  0xfb   :  { %v54_v22 = vsub.f32 %v50_v21, %v53_v20 }
  0xfd   :  { %v55_v23 = vmul.f32 0.003921569, %v54_v22 }
  0xff   :  { %v56_v24 = vmax.f32 %v55_v23, 0.0 }
 0x101   :  { %82 = vrsqrt.f32 %v56_v24  ;;  %vm64_vm1 = vcmp.eq.f32.partialorder %v56_v24, inf  ;;  %v67_v33 = vand.u32 2147483648, %v56_v24  ;;  %vm66_vm2 = vcmp.eq.f32.partialorder %v56_v24, 0.0 }
 0x107   :  { %v83_v25 = vpop.eup %82 }
 0x108   :  { %v58_v26 = vmul.f32 %v83_v25, %v56_v24 }
 0x10a   :  { %v59_v27 = vmul.f32 %v83_v25, %v58_v26 }
 0x10c   :  { %v60_v28 = vmul.f32 0.5, %v59_v27 }
 0x10e   :  { %v61_v29 = vsub.f32 1.5, %v60_v28 }
 0x110   :  { %v62_v30 = vmul.f32 %v83_v25, %v61_v29 }
 0x112   :  { %v63_v31 = vmul.f32 %v62_v30, %v56_v24 }
 0x114   :  { %v65_v35 = vsel %vm64_vm1, %v56_v24, %v63_v31 }
 0x115   :  { %v68_v36 = vsel %vm66_vm2, %v67_v33, %v65_v35 }
 0x116   :  { %v70_v37 = vsub.f32 %v68_v36, %v69_v32 }
 0x118   :  { %v72_v39 = vmul.f32 %v70_v37, %v70_v37 }
 0x11a   :  { %v73_v40 = vadd.f32 %v72_v39, %v71_v38 }
 0x11c   :  { %74 = vst.msk [vmem:[%s129_s3] sm:$0xff] %vm18_vm0, %v73_v40 }

</bundles_post_ra>
